<compile_context>
chip_gen: v5e
topology: v5e:2x2
jax: 0.10.0
libtpu: 0.0.40
codegen_flags: <defaults>
</compile_context>

<pallas_src>
import numpy as np
import jax
import jax.numpy as jnp
from jax import lax
from jax.experimental import pallas as pl
from jax.experimental.pallas import tpu as pltpu

LANE = 128
# Explicit scoped-VMEM budget: safe on v7x (64 MiB physical), raises v5e's
# 16 MiB default, leaves headroom for double-buffering.
VMEM_LIMIT = 48 * 1024 * 1024


def _round_up(x, m):
    return (x + m - 1) // m * m


def _pad_axis(a, target, axis):
    if a.shape[axis] == target:
        return a
    pads = [(0, 0)] * a.ndim
    pads[axis] = (0, target - a.shape[axis])
    return jnp.pad(a, pads)


# ---------------------------------------------------------------------------
# Tiled matmul + bias (K-accumulated)
# ---------------------------------------------------------------------------
def _matmul_bias_kernel(x_ref, w_ref, b_ref, o_ref, acc_ref):
    @pl.when(pl.program_id(2) == 0)
    def _():
        acc_ref[...] = jnp.zeros_like(acc_ref)

    acc_ref[...] += jnp.dot(x_ref[...], w_ref[...],
                            preferred_element_type=jnp.float32)

    @pl.when(pl.program_id(2) == pl.num_programs(2) - 1)
    def _():
        o_ref[...] = (acc_ref[...] + b_ref[...]).astype(o_ref.dtype)


def matmul_bias(x, w, b, out_dtype=jnp.float32):
    """(M, K) @ (K, N) + b with a tiled, K-accumulated Pallas matmul."""
    M, K = x.shape
    K2, N = w.shape
    assert K == K2 and N % LANE == 0 and b.shape == (N,)

    tm = min(256, _round_up(M, 8))
    Mp = _round_up(M, tm)
    tn = 256 if N % 256 == 0 else 128
    if K <= 512:
        tk, Kp = K, K                       # single K block (block == full dim)
    else:
        tk = 256 if K % 256 == 0 else 128
        Kp = _round_up(K, tk)

    xp = _pad_axis(_pad_axis(x, Mp, 0), Kp, 1)
    wp = _pad_axis(w, Kp, 0)

    out = pl.pallas_call(
        _matmul_bias_kernel,
        out_shape=jax.ShapeDtypeStruct((Mp, N), out_dtype),
        grid=(Mp // tm, N // tn, Kp // tk),
        in_specs=[pl.BlockSpec((tm, tk), lambda i, j, k: (i, k)),
                  pl.BlockSpec((tk, tn), lambda i, j, k: (k, j)),
                  pl.BlockSpec((1, tn), lambda i, j, k: (0, j))],
        out_specs=pl.BlockSpec((tm, tn), lambda i, j, k: (i, j)),
        scratch_shapes=[pltpu.VMEM((tm, tn), jnp.float32)],
        compiler_params=pltpu.CompilerParams(
            dimension_semantics=("parallel", "parallel", "arbitrary"),
            vmem_limit_bytes=VMEM_LIMIT),
    )(xp, wp, b.reshape(1, N).astype(jnp.float32))
    return out[:M] if Mp != M else out


# ---------------------------------------------------------------------------
# Conv wrappers
# ---------------------------------------------------------------------------
def conv1x1(x, w, b, out_dtype=jnp.float32):
    # x: (N, H, W, Cin), w: (Cin, Cout)  -- nn.Conv2d(k=1, s=1, p=0)
    N, H, W, Cin = x.shape
    Cout = w.shape[1]
    out = matmul_bias(x.reshape(N * H * W, Cin), w, b, out_dtype=out_dtype)
    return out.reshape(N, H, W, Cout)


def conv3x3_s2(x, w, b, out_dtype=jnp.bfloat16):
    # x: (N, H, W, Cin), w: (3,3,Cin,Cout) -- nn.Conv2d(k=3, s=2, p=1)
    N, H, W, Cin = x.shape
    Cout = w.shape[-1]
    Hout = (H + 1) // 2
    Wout = (W + 1) // 2
    xp = jnp.pad(x, ((0, 0), (1, 1), (1, 1), (0, 0)))
    # TODO(synk): move this im2col on-chip (halo DMA + 9 accumulated taps) to
    # avoid materializing the 9x-expanded patch tensor in HBM.
    cols = []
    for dh in range(3):
        for dw in range(3):
            cols.append(xp[:, dh:dh + 2 * Hout - 1:2, dw:dw + 2 * Wout - 1:2, :])
    patches = jnp.concatenate(cols, axis=-1).reshape(N * Hout * Wout, 9 * Cin)
    out = matmul_bias(patches, w.reshape(9 * Cin, Cout), b, out_dtype=out_dtype)
    return out.reshape(N, Hout, Wout, Cout)


# ---------------------------------------------------------------------------
# Separable bilinear upsample + lateral 1x1 conv + add (fused)
# ---------------------------------------------------------------------------
def _interp_matrix(out_size, in_size):
    """1-D interpolation matrix reproducing PyTorch bilinear,
    align_corners=False source-index semantics."""
    M = np.zeros((out_size, in_size), np.float32)
    if in_size == 1:
        M[:, 0] = 1.0
        return jnp.asarray(M)
    scale = in_size / out_size
    for o in range(out_size):
        src = max((o + 0.5) * scale - 0.5, 0.0)
        lo = min(int(np.floor(src)), in_size - 1)
        hi = lo + 1 if lo < in_size - 1 else lo
        frac = src - lo
        M[o, lo] += 1.0 - frac
        M[o, hi] += frac
    return jnp.asarray(M)


def _pick_row_tile(n_rows, bytes_per_row, budget=4 << 20):
    """Row tile for the per-level kernels: whole map when small, otherwise a
    multiple-of-8 tile so VMEM use is bounded independent of image size."""
    if n_rows <= 8:
        return n_rows, n_rows
    th = max(8, min(budget // max(bytes_per_row, 1), 512) // 8 * 8)
    th = min(th, _round_up(n_rows, 8))
    hp = _round_up(n_rows, th)
    return th, hp


def _resize_rows_kernel(r_ref, x_ref, o_ref):
    # r: (th, hin) f32, x: (hin, win*C), o: (th, win*C) f32
    o_ref[...] = jnp.dot(r_ref[...], x_ref[...].astype(jnp.float32),
                         preferred_element_type=jnp.float32)


def resize_rows(p_prev, r_mat, th, hp):
    """Bilinear interpolation along H only, as R @ x on the lane-flattened
    (hin, win*C) view.  Returns hp (>= Hout) rows; caller slices."""
    N, hin, win, C = p_prev.shape
    r_mat = _pad_axis(r_mat, hp, 0)
    x2 = p_prev.reshape(N, hin, win * C)
    out = pl.pallas_call(
        _resize_rows_kernel,
        out_shape=jax.ShapeDtypeStruct((N, hp, win * C), jnp.float32),
        grid=(N, hp // th),
        in_specs=[pl.BlockSpec((th, hin), lambda n, i: (i, 0)),
                  pl.BlockSpec((None, hin, win * C), lambda n, i: (n, 0, 0))],
        out_specs=pl.BlockSpec((None, th, win * C), lambda n, i: (n, i, 0)),
        compiler_params=pltpu.CompilerParams(
            dimension_semantics=("parallel", "parallel"),
            vmem_limit_bytes=VMEM_LIMIT),
    )(r_mat, x2)
    return out.reshape(N, hp, win, C)


def _wresize_lateral_add_kernel(cm_ref, t_ref, c_ref, wl_ref, b_ref, o_ref):
    # cm: (Wout, win) f32   -- W-interpolation matrix (resident block)
    # t : (th, win, C) f32  -- rows already H-interpolated
    # c : (th, Wout, Cin) bf16 -- backbone skip feature
    # wl: (Cin, C) bf16, b: (1, C) f32, o: (th, Wout, C) f32
    th = t_ref.shape[0]
    cm = cm_ref[...]
    cm_b = jnp.broadcast_to(cm[None], (th,) + cm.shape)
    up = jnp.einsum('hWw,hwc->hWc', cm_b, t_ref[...],
                    preferred_element_type=jnp.float32)
    wl = wl_ref[...]
    wl_b = jnp.broadcast_to(wl[None], (th,) + wl.shape)
    lat = jnp.einsum('hwc,hco->hwo', c_ref[...], wl_b,
                     preferred_element_type=jnp.float32)
    o_ref[...] = (up + lat + b_ref[...][None]).astype(o_ref.dtype)


def lateral_upsample_add(p_prev, c_i, wl, bl):
    """One fused FPN level: separable bilinear resize of p_prev to c_i's
    spatial size plus the lateral 1x1 conv of c_i plus the add."""
    N, hin, win, C = p_prev.shape
    _, Hout, Wout, Cin = c_i.shape
    r_mat = _interp_matrix(Hout, hin)
    c_mat = _interp_matrix(Wout, win)

    row_bytes = (win * C + 2 * Wout * C) * 4 + Wout * Cin * 2
    th, hp = _pick_row_tile(Hout, row_bytes)

    t = resize_rows(p_prev, r_mat, th, hp)                 # (N, hp, win, C) f32
    c_i = _pad_axis(c_i, hp, 1)

    out = pl.pallas_call(
        _wresize_lateral_add_kernel,
        out_shape=jax.ShapeDtypeStruct((N, hp, Wout, C), jnp.float32),
        grid=(N, hp // th),
        in_specs=[
            pl.BlockSpec((Wout, win), lambda n, i: (0, 0)),
            pl.BlockSpec((None, th, win, C), lambda n, i: (n, i, 0, 0)),
            pl.BlockSpec((None, th, Wout, Cin), lambda n, i: (n, i, 0, 0)),
            pl.BlockSpec((Cin, C), lambda n, i: (0, 0)),
            pl.BlockSpec((1, C), lambda n, i: (0, 0)),
        ],
        out_specs=pl.BlockSpec((None, th, Wout, C), lambda n, i: (n, i, 0, 0)),
        compiler_params=pltpu.CompilerParams(
            dimension_semantics=("parallel", "parallel"),
            vmem_limit_bytes=VMEM_LIMIT),
    )(c_mat, t, c_i, wl, bl.reshape(1, C))
    return out[:, :Hout]


# ---------------------------------------------------------------------------
# FPN forward (mirrors the PyTorch module's forward exactly)
# ---------------------------------------------------------------------------
def fpn_forward(x_nchw, kparams, return_layers, lateral_channels):
    x = jnp.transpose(x_nchw, (0, 2, 3, 1)).astype(jnp.bfloat16)   # NCHW->NHWC
    c = []
    for (w, b) in kparams["backbone"]:                              # `layers`
        x = conv3x3_s2(x, w, b, out_dtype=jnp.bfloat16)
        c.append(x)
    min_ret = min(return_layers)
    wl, bl = kparams["lateral"][-1]
    p = [conv1x1(c[-1], wl, bl, out_dtype=jnp.float32)]
    for i in range(len(c) - 2, min_ret - 1, -1):
        wl, bl = kparams["lateral"][i - min_ret]
        p.append(lateral_upsample_add(p[-1], c[i], wl, bl))
    p = p[::-1]
    outs = []
    for l in return_layers:
        o = p[l - min_ret][..., :lateral_channels]       # drop lane padding
        outs.append(jnp.transpose(o, (0, 3, 1, 2)))      # NHWC -> NCHW
    return outs if len(outs) > 1 else outs[0]


# ---------------------------------------------------------------------------
# Parameter init (unpadded f32) and lane-padded bf16 kernel params
# ---------------------------------------------------------------------------
def init_params(key, in_ch, out_channels, lateral_channels, min_ret):
    params = {"backbone": [], "lateral": []}
    n_keys = 2 * len(out_channels) + 2 * (len(out_channels) - min_ret)
    ks = jax.random.split(key, n_keys)
    idx = 0
    cin = in_ch
    for cout in out_channels:
        w = jax.random.normal(ks[idx], (3, 3, cin, cout), jnp.float32) / np.sqrt(9 * cin)
        idx += 1
        b = 0.01 * jax.random.normal(ks[idx], (cout,), jnp.float32)
        idx += 1
        params["backbone"].append((w, b))
        cin = cout
    for i in range(min_ret, len(out_channels)):
        ci = out_channels[i]
        w = jax.random.normal(ks[idx], (ci, lateral_channels), jnp.float32) / np.sqrt(ci)
        idx += 1
        b = 0.01 * jax.random.normal(ks[idx], (lateral_channels,), jnp.float32)
        idx += 1
        params["lateral"].append((w, b))
    return params


def prepare_kernel_params(params, in_ch):
    """Zero-pad every output-channel dim to a multiple of 128 (lane-dense
    stores / full MXU width) and cast weights to bf16 (biases stay f32)."""
    kp = {"backbone": [], "lateral": []}
    cin_p = in_ch
    for (w, b) in params["backbone"]:
        cout_p = _round_up(w.shape[-1], LANE)
        wp = _pad_axis(_pad_axis(w, cin_p, 2), cout_p, 3).astype(jnp.bfloat16)
        kp["backbone"].append((wp, _pad_axis(b, cout_p, 0)))
        cin_p = cout_p
    for (w, b) in params["lateral"]:
        ci_p = _round_up(w.shape[0], LANE)
        co_p = _round_up(w.shape[1], LANE)
        wp = _pad_axis(_pad_axis(w, ci_p, 0), co_p, 1).astype(jnp.bfloat16)
        kp["lateral"].append((wp, _pad_axis(b, co_p, 0)))
    return kp


# ---------------------------------------------------------------------------
# Pure-JAX reference (independent path: lax.conv + dense einsum bilinear),
# with the same bf16 quantization of weights/activations as the kernel path.
# ---------------------------------------------------------------------------
def fpn_reference(x_nchw, params, return_layers):
    dn = ("NHWC", "HWIO", "NHWC")
    q = lambda a: a.astype(jnp.bfloat16).astype(jnp.float32)
    x = q(jnp.transpose(x_nchw, (0, 2, 3, 1)))
    c = []
    for (w, b) in params["backbone"]:
        x = lax.conv_general_dilated(x, q(w), (2, 2), ((1, 1), (1, 1)),
                                     dimension_numbers=dn) + b
        x = q(x)
        c.append(x)
    min_ret = min(return_layers)
    lats = []
    for i, (w, b) in zip(range(min_ret, len(c)), params["lateral"]):
        lw = q(w).reshape(1, 1, *w.shape)
        lats.append(lax.conv_general_dilated(c[i], lw, (1, 1), "VALID",
                                             dimension_numbers=dn) + b)

    def up_add(xs, yb):
        _, hin, win, _ = xs.shape
        _, Ho, Wo, _ = yb.shape
        R = _interp_matrix(Ho, hin)
        Cm = _interp_matrix(Wo, win)
        return jnp.einsum("Hh,Ww,nhwc->nHWc", R, Cm, xs) + yb

    p = [lats[-1]]
    for i in range(len(c) - 2, min_ret - 1, -1):
        p.append(up_add(p[-1], lats[i - min_ret]))
    p = p[::-1]
    outs = [jnp.transpose(p[l - min_ret], (0, 3, 1, 2)) for l in return_layers]
    return outs if len(outs) > 1 else outs[0]


if __name__ == "__main__":
    key = jax.random.PRNGKey(0)
    kx, kp_key = jax.random.split(key)

    # Small config: backbone = 3 stride-2 3x3 conv "layers" (the FPN's `layers`
    # argument), out_channels per layer, 16 lateral channels.
    N, Cin, H, W = 2, 4, 16, 16
    out_channels = [8, 16, 32]
    lateral_channels = 16
    return_layers = [0, 1]   # module default: list(range(len(layers) - 1))

    x = jax.random.normal(kx, (N, Cin, H, W), jnp.float32)
    params = init_params(kp_key, Cin, out_channels, lateral_channels, min(return_layers))
    kparams = prepare_kernel_params(params, Cin)

    outs = fpn_forward(x, kparams, return_layers, lateral_channels)
    outs = jax.block_until_ready(outs)

    refs = fpn_reference(x, params, return_layers)
    for o, r in zip(outs, refs):
        np.testing.assert_allclose(np.asarray(o), np.asarray(r), rtol=2e-2, atol=2e-2)
    assert [tuple(o.shape) for o in outs] == [(2, 16, 8, 8), (2, 16, 4, 4)]

    print("KERNEL_OK")
</pallas_src>

<mosaic_0001>
module attributes {stable_mosaic.version = 11 : i64} {
  func.func @_matmul_bias_kernel(%arg0: i32, %arg1: i32, %arg2: i32, %arg3: memref<128x36xbf16, #tpu.memory_space<vmem>>, %arg4: memref<36x128xbf16, #tpu.memory_space<vmem>>, %arg5: memref<1x128xf32, #tpu.memory_space<vmem>>, %arg6: memref<128x128xbf16, #tpu.memory_space<vmem>>, %arg7: memref<128x128xf32, #tpu.memory_space<vmem>>) attributes {dimension_semantics = [#tpu.dimension_semantics<parallel>, #tpu.dimension_semantics<parallel>, #tpu.dimension_semantics<arbitrary>], iteration_bounds = array<i64: 1, 1, 1>, scalar_prefetch = 0 : i64, scratch_operands = 1 : i64, tpu.core_type = #tpu.core_type<tc>, window_params = [{transform_indices = @transform_0, window_bounds = array<i64: 128, 36>}, {transform_indices = @transform_1, window_bounds = array<i64: 36, 128>}, {transform_indices = @transform_2, window_bounds = array<i64: 1, 128>}, {transform_indices = @transform_3, window_bounds = array<i64: 128, 128>}]} {
    %c0_i32 = arith.constant 0 : i32
    %0 = arith.cmpi eq, %arg2, %c0_i32 : i32
    %1 = arith.extui %0 : i1 to i32
    %c0_i32_0 = arith.constant 0 : i32
    %2 = arith.cmpi ne, %1, %c0_i32_0 : i32
    scf.if %2 {
      %cst_10 = arith.constant 0.000000e+00 : f32
      %12 = vector.broadcast %cst_10 : f32 to vector<128x128xf32>
      %c0_11 = arith.constant 0 : index
      %c0_12 = arith.constant 0 : index
      %13 = vector.load %arg7[%c0_11, %c0_12] : memref<128x128xf32, #tpu.memory_space<vmem>>, vector<128x128xf32>
      tpu.vector_store %arg7[%c0_11, %c0_12], %12 {strides = array<i32>} : memref<128x128xf32, #tpu.memory_space<vmem>>, vector<128x128xf32>,
    } else {
    }
    %c0 = arith.constant 0 : index
    %c0_1 = arith.constant 0 : index
    %3 = vector.load %arg7[%c0, %c0_1] : memref<128x128xf32, #tpu.memory_space<vmem>>, vector<128x128xf32>
    %c0_2 = arith.constant 0 : index
    %c0_3 = arith.constant 0 : index
    %4 = vector.load %arg3[%c0_2, %c0_3] : memref<128x36xbf16, #tpu.memory_space<vmem>>, vector<128x36xbf16>
    %c0_4 = arith.constant 0 : index
    %c0_5 = arith.constant 0 : index
    %5 = vector.load %arg4[%c0_4, %c0_5] : memref<36x128xbf16, #tpu.memory_space<vmem>>, vector<36x128xbf16>
    %cst = arith.constant dense<0.000000e+00> : vector<128x128xf32>
    %6 = tpu.matmul %4, %5, %cst {dimension_numbers = #tpu.dot_dimension_numbers<[1], [0], [0], [1], [0, 0, 1, 1], [], []>} : vector<128x36xbf16>, vector<36x128xbf16>, vector<128x128xf32> -> vector<128x128xf32>
    %7 = arith.addf %3, %6 : vector<128x128xf32>
    %c0_6 = arith.constant 0 : index
    %c0_7 = arith.constant 0 : index
    %8 = vector.load %arg7[%c0_6, %c0_7] : memref<128x128xf32, #tpu.memory_space<vmem>>, vector<128x128xf32>
    tpu.vector_store %arg7[%c0_6, %c0_7], %7 {strides = array<i32>} : memref<128x128xf32, #tpu.memory_space<vmem>>, vector<128x128xf32>,
    %c0_i32_8 = arith.constant 0 : i32
    %9 = arith.cmpi eq, %arg2, %c0_i32_8 : i32
    %10 = arith.extui %9 : i1 to i32
    %c0_i32_9 = arith.constant 0 : i32
    %11 = arith.cmpi ne, %10, %c0_i32_9 : i32
    scf.if %11 {
      %c0_10 = arith.constant 0 : index
      %c0_11 = arith.constant 0 : index
      %12 = vector.load %arg7[%c0_10, %c0_11] : memref<128x128xf32, #tpu.memory_space<vmem>>, vector<128x128xf32>
      %c0_12 = arith.constant 0 : index
      %c0_13 = arith.constant 0 : index
      %13 = vector.load %arg5[%c0_12, %c0_13] : memref<1x128xf32, #tpu.memory_space<vmem>>, vector<1x128xf32>
      %14 = vector.broadcast %13 : vector<1x128xf32> to vector<128x128xf32>
      %15 = arith.addf %12, %14 : vector<128x128xf32>
      %16 = arith.truncf %15 : vector<128x128xf32> to vector<128x128xbf16>
      %c0_14 = arith.constant 0 : index
      %c0_15 = arith.constant 0 : index
      %17 = vector.load %arg6[%c0_14, %c0_15] : memref<128x128xbf16, #tpu.memory_space<vmem>>, vector<128x128xbf16>
      tpu.vector_store %arg6[%c0_14, %c0_15], %16 {strides = array<i32>} : memref<128x128xbf16, #tpu.memory_space<vmem>>, vector<128x128xbf16>,
    } else {
    }
    return
  }
  func.func @transform_0(%arg0: i32, %arg1: i32, %arg2: i32) -> (i32, i32) {
    %c0_i32 = arith.constant 0 : i32
    return %arg0, %arg2 : i32, i32
  }
  func.func @transform_1(%arg0: i32, %arg1: i32, %arg2: i32) -> (i32, i32) {
    %c0_i32 = arith.constant 0 : i32
    return %arg2, %arg1 : i32, i32
  }
  func.func @transform_2(%arg0: i32, %arg1: i32, %arg2: i32) -> (i32, i32) {
    %c0_i32 = arith.constant 0 : i32
    %c0_i32_0 = arith.constant 0 : i32
    return %c0_i32, %arg1 : i32, i32
  }
  func.func @transform_3(%arg0: i32, %arg1: i32, %arg2: i32) -> (i32, i32) {
    %c0_i32 = arith.constant 0 : i32
    return %arg0, %arg1 : i32, i32
  }
}

</mosaic_0001>

<bundles_post_ra>
// kernel: tpu_custom_call.1
= control target key start
LH: loop header
LB: loop body
LE: loop exit
PB: predicated region body
PF: predicated region fallthrough
CT: control target
= control target key end

     0   :  { %vm153_vm0 = vcmask 1041408   ;;  %s541_s0 = inlined_call_operand.vmem [shape: bf16[128,36], index: 0, kind: input, shape index: {}]   ;;  %s542_s1 = inlined_call_operand.vmem [shape: bf16[36,128], index: 1, kind: input, shape index: {}]   ;;  %s543_s2 = inlined_call_operand.vmem [shape: f32[1,128], index: 2, kind: input, shape index: {}]   ;;  %s544_s3 = inlined_call_operand.hbm [shape: bf16[128,128], index: 3, kind: output, shape index: {}]  }
   0x1   :  { %v72_v0 = vld [vmem:[%s542_s1 + $0x10] sm:$0x3] }
   0x2   :  { %v122_v1 = vunpack.c.l.b16 %v72_v0 }
   0x4   :  { %v125_v2 = vpack.c.b16 %v122_v1, %v122_v1 }
   0x5   :  { %8 = vsyncpa [#allocation4], 0  ;;  %v384_v4 = vld [vmem:[%s542_s1 + $0x8] sm:$0xff]  ;;  %v383_v5 = vld [vmem:[%s542_s1] sm:$0xff]  ;;  %vm128_vm1 = vcmask 293888   ;;  %s315_s10 = sshll.u32 %s544_s3, 4  ;;  %s316_s10 = int_to_ptr.hbm [resolvable:$true] %s315_s10 }
   0x6   :  { %v155_v3 = vsel %vm153_vm0, %v125_v2, 0  ;;  %v375_v6 = vld [vmem:[%s541_s0] sm:$0xff]  ;;  %v377_v7 = vld [vmem:[%s541_s0 + $0x10] sm:$0xff]  ;;  %v376_v10 = vld [vmem:[%s541_s0 + $0x8] sm:$0xff]  ;;  %s472_s11 = smov 64   ;;  %s473_s12 = smov 4  }
   0x7   :  { %162 = vmatpush.bf16.msra.mxu0 %v155_v3  ;;  %432 = vmatpush.bf16.msra.mxu1 %v155_v3  ;;  %v379_v8 = vld [vmem:[%s541_s0 + $0x20] sm:$0xff]  ;;  %v381_v9 = vld [vmem:[%s541_s0 + $0x30] sm:$0xff]  ;;  %v378_v11 = vld [vmem:[%s541_s0 + $0x18] sm:$0xff] }
   0x8   :  { %433 = vmatpush.bf16.msra.mxu2 %v155_v3  ;;  %434 = vmatpush.bf16.msra.mxu3 %v155_v3  ;;  %v380_v12 = vld [vmem:[%s541_s0 + $0x28] sm:$0xff]  ;;  %v382_v13 = vld [vmem:[%s541_s0 + $0x38] sm:$0xff]  ;;  %v444_v16 = vld [vmem:[%s543_s2] ss:$0 sm:$0xff]  ;;  %s471_s0 = smov [#allocation3]  }
   0x9   :  { %s313_s2 = sshll.u32 %s471_s0, 4  ;;  %s314_s2 = int_to_ptr.vmem [resolvable:$true] %s313_s2 }
   0xb   :  { %163 = vmatpush.bf16.msra.mxu0 %v384_v4  ;;  %435 = vmatpush.bf16.msra.mxu1 %v384_v4 }
   0xc   :  { %436 = vmatpush.bf16.msra.mxu2 %v384_v4  ;;  %437 = vmatpush.bf16.msra.mxu3 %v384_v4 }
   0xf   :  { %164 = vmatpush.bf16.msra.mxu0 %v383_v5  ;;  %438 = vmatpush.bf16.msra.mxu1 %v383_v5 }
  0x10   :  { %439 = vmatpush.bf16.msra.mxu2 %v383_v5  ;;  %440 = vmatpush.bf16.msra.mxu3 %v383_v5 }
  0x12   :  { %367 = vmatmul.msk.bf16.vlgmr.msra.gmra.mxu0 %vm128_vm1, %v375_v6  ;;  %369 = vmatmul.msk.bf16.vlgmr.msra.gmra.mxu1 %vm128_vm1, %v377_v7 }
  0x13   :  { %371 = vmatmul.msk.bf16.vlgmr.msra.gmra.mxu2 %vm128_vm1, %v379_v8  ;;  %373 = vmatmul.msk.bf16.vlgmr.msra.gmra.mxu3 %vm128_vm1, %v381_v9 }
  0x22   :  { %368 = vmatmul.msk.bf16.gmra.mxu0 %vm128_vm1, %v376_v10  ;;  %370 = vmatmul.msk.bf16.gmra.mxu1 %vm128_vm1, %v378_v11 }
  0x23   :  { %372 = vmatmul.msk.bf16.gmra.mxu2 %vm128_vm1, %v380_v12  ;;  %374 = vmatmul.msk.bf16.gmra.mxu3 %vm128_vm1, %v382_v13 }
  0x8f   :  { %v166_v14 = vpop.f32.mrf.mxu0  ;;  %v176_v15 = vpop.f32.mrf.mxu1 }
  0x90   :  { %v261_v21 = vadd.f32 %v444_v16, %v166_v14  ;;  %v265_v22 = vadd.f32 %v444_v16, %v176_v15 }
  0x96   :  { %v186_v17 = vpop.f32.mrf.mxu2  ;;  %v196_v18 = vpop.f32.mrf.mxu3 }
  0x97   :  { %v168_v19 = vpop.f32.mrf.mxu0  ;;  %v178_v20 = vpop.f32.mrf.mxu1  ;;  %v269_v29 = vadd.f32 %v444_v16, %v186_v17  ;;  %v273_v30 = vadd.f32 %v444_v16, %v196_v18 }
  0x98   :  { %v262_v23 = vadd.f32 %v444_v16, %v168_v19  ;;  %v266_v24 = vadd.f32 %v444_v16, %v178_v20 }
  0x9a   :  { %v388_v25 = vpack.c.bf16 %v262_v23, %v261_v21  ;;  %v398_v26 = vpack.c.bf16 %v266_v24, %v265_v22 }
  0x9c   :  { %389 = vst [vmem:[#allocation3] sm:$0xff] %v388_v25  }
  0x9d   :  { %426 = vst [vmem:[#allocation3 + $0x10] sm:$0xff] %v398_v26  }
  0x9e   :  { %v188_v27 = vpop.f32.mrf.mxu2  ;;  %v198_v28 = vpop.f32.mrf.mxu3 }
  0x9f   :  { %v270_v31 = vadd.f32 %v444_v16, %v188_v27  ;;  %v274_v32 = vadd.f32 %v444_v16, %v198_v28  ;;  %v171_v33 = vpop.f32.mrf.mxu0  ;;  %v181_v34 = vpop.f32.mrf.mxu1 }
  0xa0   :  { %v263_v41 = vadd.f32 %v444_v16, %v171_v33  ;;  %v267_v42 = vadd.f32 %v444_v16, %v181_v34 }
  0xa1   :  { %v408_v35 = vpack.c.bf16 %v270_v31, %v269_v29  ;;  %v418_v36 = vpack.c.bf16 %v274_v32, %v273_v30 }
  0xa3   :  { %428 = vst [vmem:[#allocation3 + $0x20] sm:$0xff] %v408_v35  }
  0xa4   :  { %430 = vst [vmem:[#allocation3 + $0x30] sm:$0xff] %v418_v36  }
  0xa6   :  { %v191_v37 = vpop.f32.mrf.mxu2  ;;  %v201_v38 = vpop.f32.mrf.mxu3 }
  0xa7   :  { %v173_v39 = vpop.f32.mrf.mxu0  ;;  %v183_v40 = vpop.f32.mrf.mxu1  ;;  %v271_v49 = vadd.f32 %v444_v16, %v191_v37  ;;  %v275_v50 = vadd.f32 %v444_v16, %v201_v38 }
  0xa8   :  { %v264_v43 = vadd.f32 %v444_v16, %v173_v39  ;;  %v268_v44 = vadd.f32 %v444_v16, %v183_v40 }
  0xaa   :  { %v393_v45 = vpack.c.bf16 %v264_v43, %v263_v41  ;;  %v403_v46 = vpack.c.bf16 %v268_v44, %v267_v42 }
  0xac   :  { %425 = vst [vmem:[#allocation3 + $0x8] sm:$0xff] %v393_v45  }
  0xad   :  { %427 = vst [vmem:[#allocation3 + $0x18] sm:$0xff] %v403_v46  }
  0xae   :  { %v193_v47 = vpop.f32.mrf.mxu2  ;;  %v203_v48 = vpop.f32.mrf.mxu3 }
  0xaf   :  { %v272_v51 = vadd.f32 %v444_v16, %v193_v47  ;;  %v276_v52 = vadd.f32 %v444_v16, %v203_v48 }
  0xb1   :  { %v413_v53 = vpack.c.bf16 %v272_v51, %v271_v49  ;;  %v423_v54 = vpack.c.bf16 %v276_v52, %v275_v50 }
  0xb3   :  { %429 = vst [vmem:[#allocation3 + $0x28] sm:$0xff] %v413_v53  }
  0xb4   :  { %431 = vst [vmem:[#allocation3 + $0x38] sm:$0xff] %v423_v54  }
  0xb5   :  { %321 = dma.vmem_to_hbm [thread:$0]  %s314_s2, 1024, %s316_s10, [#allocation4], %s472_s11, %s472_s11, %s473_s12  }
  0xb6   :  { %469 = dma.done.wait [#allocation4], 1024  }
  0xb7   :  { %470 = vsyncadd [#allocation4], 4294966272 }
  0xb8   :  { %326 = vsyncpa [#allocation4], 1 }

</bundles_post_ra>
